<compile_context>
chip_gen: v7x
topology: tpu7x:2x2x1
jax: 0.10.0
libtpu: 0.0.40
codegen_flags: <defaults>
</compile_context>

<pallas_src>
import jax
import jax.numpy as jnp
from jax.experimental import pallas as pl
from jax.experimental.pallas import tpu as pltpu


def _round_up(x, m):
    return ((x + m - 1) // m) * m


def _value_mlp_kernel(xT_ref, w1_ref, b1_ref, w2_ref, b2_ref, w3_ref, b3_ref,
                      o_ref):
    """Fused 3-layer MLP on one (obs_dim, TB) tile; batch on the lane axis."""
    xT = xT_ref[...]                                                # [D, TB] bf16
    # Layer 1: [H, D] @ [D, TB] -> [H, TB]  (N = TB lane-full on the MXU)
    h1 = jnp.dot(w1_ref[...], xT,
                 preferred_element_type=jnp.float32) + b1_ref[...]  # f32
    h1 = jnp.maximum(h1, 0.0)                                       # ReLU
    # Layer 2: [H, H] @ [H, TB] -> [H, TB]
    h2 = jnp.dot(w2_ref[...], h1.astype(w2_ref.dtype),
                 preferred_element_type=jnp.float32) + b2_ref[...]  # f32
    h2 = jnp.maximum(h2, 0.0)                                       # ReLU
    # Layer 3 (out_features = 1): [1, H] @ [H, TB] -> lane-dense [1, TB] row.
    out = jnp.dot(w3_ref[...], h2.astype(w3_ref.dtype),
                  preferred_element_type=jnp.float32) + b3_ref[...]
    o_ref[...] = out.astype(o_ref.dtype)                            # [1, TB]


def value_network_forward(obs, params, *, block_b=4096):
    """obs: [B, obs_dim] float32 -> [B] float32 (squeeze(-1) applied)."""
    w1, b1, w2, b2, w3, b3 = (params["w1"], params["b1"], params["w2"],
                              params["b2"], params["w3"], params["b3"])
    B, obs_dim = obs.shape
    hidden = w1.shape[0]                       # PyTorch layout: [out, in]

    # ---- Tile selection: batch sits on the lane axis -> TB multiple of 128 ----
    block_b = max(128, _round_up(int(block_b), 128))
    n_steps = max(1, -(-B // block_b))
    if n_steps == 1 and B > 128:
        # Give v7x's second TensorCore something to do (no-op cost on v5e/v6e,
        # VMEM footprint is tiny either way).
        n_steps = 2
    TB = _round_up(-(-B // n_steps), 128)      # adaptive: keeps padding < 128*n
    B_pad = TB * n_steps

    # ---- Operand prep: transposed bf16 obs stream, resident weights ----
    obs_t = obs.astype(jnp.bfloat16).T                          # [D, B]
    if B_pad != B:
        obs_t = jnp.pad(obs_t, ((0, 0), (0, B_pad - B)))        # [D, B_pad]

    w1_bf = w1.astype(jnp.bfloat16)                             # [H, D]
    w2_bf = w2.astype(jnp.bfloat16)                             # [H, H]
    w3_bf = w3.reshape(1, hidden).astype(jnp.bfloat16)          # [1, H]
    b1_c = b1.reshape(hidden, 1).astype(jnp.float32)            # [H, 1]
    b2_c = b2.reshape(hidden, 1).astype(jnp.float32)            # [H, 1]
    b3_c = b3.reshape(1, 1).astype(jnp.float32)                 # [1, 1]

    flops = 2 * B_pad * (obs_dim * hidden + hidden * hidden + hidden)
    bytes_accessed = (obs_t.size * 2
                      + (w1_bf.size + w2_bf.size + w3_bf.size) * 2
                      + (b1_c.size + b2_c.size + b3_c.size) * 4
                      + B_pad * 4)

    out = pl.pallas_call(
        _value_mlp_kernel,
        out_shape=jax.ShapeDtypeStruct((1, B_pad), jnp.float32),
        grid=(n_steps,),
        in_specs=[
            pl.BlockSpec((obs_dim, TB), lambda i: (0, i)),       # obs^T (streamed)
            pl.BlockSpec((hidden, obs_dim), lambda i: (0, 0)),   # W1 (resident)
            pl.BlockSpec((hidden, 1), lambda i: (0, 0)),         # b1 column
            pl.BlockSpec((hidden, hidden), lambda i: (0, 0)),    # W2
            pl.BlockSpec((hidden, 1), lambda i: (0, 0)),         # b2 column
            pl.BlockSpec((1, hidden), lambda i: (0, 0)),         # w3 row
            pl.BlockSpec((1, 1), lambda i: (0, 0)),              # b3
        ],
        out_specs=pl.BlockSpec((1, TB), lambda i: (0, i)),       # lane-dense row
        compiler_params=pltpu.CompilerParams(
            dimension_semantics=("parallel",)),
        cost_estimate=pl.CostEstimate(flops=flops, transcendentals=0,
                                      bytes_accessed=bytes_accessed),
    )(obs_t, w1_bf, b1_c, w2_bf, b2_c, w3_bf, b3_c)

    return out[0, :B]  # drop batch padding; this is the module's squeeze(-1)


def init_params(key, obs_dim, hidden_size=64):
    """Deterministic init mimicking nn.Linear (U(-1/sqrt(fan_in), +...)),
    stored in PyTorch layout: W [out, in], b [out]."""
    ks = jax.random.split(key, 6)

    def lin(kw, kb, fan_in, fan_out):
        bound = 1.0 / jnp.sqrt(float(fan_in))
        w = jax.random.uniform(kw, (fan_out, fan_in), jnp.float32, -bound, bound)
        b = jax.random.uniform(kb, (fan_out,), jnp.float32, -bound, bound)
        return w, b

    w1, b1 = lin(ks[0], ks[1], obs_dim, hidden_size)
    w2, b2 = lin(ks[2], ks[3], hidden_size, hidden_size)
    w3, b3 = lin(ks[4], ks[5], hidden_size, 1)
    return {"w1": w1, "b1": b1, "w2": w2, "b2": b2, "w3": w3, "b3": b3}


def _reference_forward(obs, p):
    """Pure-JAX f32 reference of the PyTorch forward for verification."""
    h = jnp.maximum(obs @ p["w1"].T + p["b1"], 0.0)
    h = jnp.maximum(h @ p["w2"].T + p["b2"], 0.0)
    return (h @ p["w3"].T + p["b3"])[:, 0]


if __name__ == "__main__":
    key = jax.random.PRNGKey(0)
    k_obs, k_param = jax.random.split(key)

    batch = 8
    obs_dim = 16
    hidden_size = 64

    obs = jax.random.normal(k_obs, (batch, obs_dim), dtype=jnp.float32)
    params = init_params(k_param, obs_dim, hidden_size)

    value = value_network_forward(obs, params)
    value = jax.block_until_ready(value)

    ref = _reference_forward(obs, params)
    assert value.shape == (batch,), value.shape
    # bf16 matmul operands -> loosened tolerance vs the f32 reference.
    assert jnp.allclose(value, ref, atol=5e-2, rtol=5e-2), (value, ref)

    print("KERNEL_OK")
</pallas_src>

<mosaic_0001>
module attributes {stable_mosaic.version = 11 : i64} {
  func.func @_value_mlp_kernel(%arg0: i32, %arg1: memref<16x128xbf16, #tpu.memory_space<vmem>>, %arg2: memref<64x16xbf16, #tpu.memory_space<vmem>>, %arg3: memref<64x1xf32, #tpu.memory_space<vmem>>, %arg4: memref<64x64xbf16, #tpu.memory_space<vmem>>, %arg5: memref<64x1xf32, #tpu.memory_space<vmem>>, %arg6: memref<1x64xbf16, #tpu.memory_space<vmem>>, %arg7: memref<1x1xf32, #tpu.memory_space<vmem>>, %arg8: memref<1x128xf32, #tpu.memory_space<vmem>>) attributes {dimension_semantics = [#tpu.dimension_semantics<parallel>], iteration_bounds = array<i64: 1>, scalar_prefetch = 0 : i64, scratch_operands = 0 : i64, tpu.core_type = #tpu.core_type<tc>, window_params = [{transform_indices = @transform_0, window_bounds = array<i64: 16, 128>}, {pipeline_mode = #tpu.pipeline_mode<synchronous>, transform_indices = @transform_1, window_bounds = array<i64: 64, 16>}, {pipeline_mode = #tpu.pipeline_mode<synchronous>, transform_indices = @transform_2, window_bounds = array<i64: 64, 1>}, {pipeline_mode = #tpu.pipeline_mode<synchronous>, transform_indices = @transform_3, window_bounds = array<i64: 64, 64>}, {pipeline_mode = #tpu.pipeline_mode<synchronous>, transform_indices = @transform_4, window_bounds = array<i64: 64, 1>}, {pipeline_mode = #tpu.pipeline_mode<synchronous>, transform_indices = @transform_5, window_bounds = array<i64: 1, 64>}, {pipeline_mode = #tpu.pipeline_mode<synchronous>, transform_indices = @transform_6, window_bounds = array<i64: 1, 1>}, {transform_indices = @transform_7, window_bounds = array<i64: 1, 128>}]} {
    %c0 = arith.constant 0 : index
    %c0_0 = arith.constant 0 : index
    %0 = vector.load %arg1[%c0, %c0_0] : memref<16x128xbf16, #tpu.memory_space<vmem>>, vector<16x128xbf16>
    %c0_1 = arith.constant 0 : index
    %c0_2 = arith.constant 0 : index
    %1 = vector.load %arg2[%c0_1, %c0_2] : memref<64x16xbf16, #tpu.memory_space<vmem>>, vector<64x16xbf16>
    %cst = arith.constant dense<0.000000e+00> : vector<64x128xf32>
    %2 = tpu.matmul %1, %0, %cst {dimension_numbers = #tpu.dot_dimension_numbers<[1], [0], [0], [1], [0, 0, 1, 1], [], []>} : vector<64x16xbf16>, vector<16x128xbf16>, vector<64x128xf32> -> vector<64x128xf32>
    %c0_3 = arith.constant 0 : index
    %c0_4 = arith.constant 0 : index
    %3 = vector.load %arg3[%c0_3, %c0_4] : memref<64x1xf32, #tpu.memory_space<vmem>>, vector<64x1xf32>
    %4 = vector.broadcast %3 : vector<64x1xf32> to vector<64x128xf32>
    %5 = arith.addf %2, %4 : vector<64x128xf32>
    %cst_5 = arith.constant 0.000000e+00 : f32
    %6 = vector.broadcast %cst_5 : f32 to vector<64x128xf32>
    %7 = arith.maximumf %5, %6 : vector<64x128xf32>
    %c0_6 = arith.constant 0 : index
    %c0_7 = arith.constant 0 : index
    %8 = vector.load %arg4[%c0_6, %c0_7] : memref<64x64xbf16, #tpu.memory_space<vmem>>, vector<64x64xbf16>
    %9 = arith.truncf %7 : vector<64x128xf32> to vector<64x128xbf16>
    %cst_8 = arith.constant dense<0.000000e+00> : vector<64x128xf32>
    %10 = tpu.matmul %8, %9, %cst_8 {dimension_numbers = #tpu.dot_dimension_numbers<[1], [0], [0], [1], [0, 0, 1, 1], [], []>} : vector<64x64xbf16>, vector<64x128xbf16>, vector<64x128xf32> -> vector<64x128xf32>
    %c0_9 = arith.constant 0 : index
    %c0_10 = arith.constant 0 : index
    %11 = vector.load %arg5[%c0_9, %c0_10] : memref<64x1xf32, #tpu.memory_space<vmem>>, vector<64x1xf32>
    %12 = vector.broadcast %11 : vector<64x1xf32> to vector<64x128xf32>
    %13 = arith.addf %10, %12 : vector<64x128xf32>
    %cst_11 = arith.constant 0.000000e+00 : f32
    %14 = vector.broadcast %cst_11 : f32 to vector<64x128xf32>
    %15 = arith.maximumf %13, %14 : vector<64x128xf32>
    %c0_12 = arith.constant 0 : index
    %c0_13 = arith.constant 0 : index
    %16 = vector.load %arg6[%c0_12, %c0_13] : memref<1x64xbf16, #tpu.memory_space<vmem>>, vector<1x64xbf16>
    %17 = arith.truncf %15 : vector<64x128xf32> to vector<64x128xbf16>
    %cst_14 = arith.constant dense<0.000000e+00> : vector<1x128xf32>
    %18 = tpu.matmul %16, %17, %cst_14 {dimension_numbers = #tpu.dot_dimension_numbers<[1], [0], [0], [1], [0, 0, 1, 1], [], []>} : vector<1x64xbf16>, vector<64x128xbf16>, vector<1x128xf32> -> vector<1x128xf32>
    %c0_15 = arith.constant 0 : index
    %c0_16 = arith.constant 0 : index
    %19 = vector.load %arg7[%c0_15, %c0_16] : memref<1x1xf32, #tpu.memory_space<vmem>>, vector<1x1xf32>
    %20 = vector.broadcast %19 : vector<1x1xf32> to vector<1x128xf32>
    %21 = arith.addf %18, %20 : vector<1x128xf32>
    %c0_17 = arith.constant 0 : index
    %c0_18 = arith.constant 0 : index
    %22 = vector.load %arg8[%c0_17, %c0_18] : memref<1x128xf32, #tpu.memory_space<vmem>>, vector<1x128xf32>
    tpu.vector_store %arg8[%c0_17, %c0_18], %21 {strides = array<i32>} : memref<1x128xf32, #tpu.memory_space<vmem>>, vector<1x128xf32>,
    return
  }
  func.func @transform_0(%arg0: i32) -> (i32, i32) {
    %c0_i32 = arith.constant 0 : i32
    %c0_i32_0 = arith.constant 0 : i32
    return %c0_i32, %arg0 : i32, i32
  }
  func.func @transform_1(%arg0: i32) -> (i32, i32) {
    %c0_i32 = arith.constant 0 : i32
    %c0_i32_0 = arith.constant 0 : i32
    %c0_i32_1 = arith.constant 0 : i32
    return %c0_i32, %c0_i32_0 : i32, i32
  }
  func.func @transform_2(%arg0: i32) -> (i32, i32) {
    %c0_i32 = arith.constant 0 : i32
    %c0_i32_0 = arith.constant 0 : i32
    %c0_i32_1 = arith.constant 0 : i32
    return %c0_i32, %c0_i32_0 : i32, i32
  }
  func.func @transform_3(%arg0: i32) -> (i32, i32) {
    %c0_i32 = arith.constant 0 : i32
    %c0_i32_0 = arith.constant 0 : i32
    %c0_i32_1 = arith.constant 0 : i32
    return %c0_i32, %c0_i32_0 : i32, i32
  }
  func.func @transform_4(%arg0: i32) -> (i32, i32) {
    %c0_i32 = arith.constant 0 : i32
    %c0_i32_0 = arith.constant 0 : i32
    %c0_i32_1 = arith.constant 0 : i32
    return %c0_i32, %c0_i32_0 : i32, i32
  }
  func.func @transform_5(%arg0: i32) -> (i32, i32) {
    %c0_i32 = arith.constant 0 : i32
    %c0_i32_0 = arith.constant 0 : i32
    %c0_i32_1 = arith.constant 0 : i32
    return %c0_i32, %c0_i32_0 : i32, i32
  }
  func.func @transform_6(%arg0: i32) -> (i32, i32) {
    %c0_i32 = arith.constant 0 : i32
    %c0_i32_0 = arith.constant 0 : i32
    %c0_i32_1 = arith.constant 0 : i32
    return %c0_i32, %c0_i32_0 : i32, i32
  }
  func.func @transform_7(%arg0: i32) -> (i32, i32) {
    %c0_i32 = arith.constant 0 : i32
    %c0_i32_0 = arith.constant 0 : i32
    return %c0_i32, %arg0 : i32, i32
  }
}

</mosaic_0001>

<bundles_post_ra>
// kernel: tpu_custom_call.1
= control target key start
LH: loop header
LB: loop body
LE: loop exit
PB: predicated region body
PF: predicated region fallthrough
CT: control target
= control target key end

     0   :  { %s698_s0 = inlined_call_operand.vmem [shape: bf16[16,128], index: 0, kind: input, shape index: {}]   ;;  %s699_s1 = inlined_call_operand.vmem [shape: bf16[64,16], index: 1, kind: input, shape index: {}]   ;;  %s700_s2 = inlined_call_operand.vmem [shape: f32[64,1], index: 2, kind: input, shape index: {}]   ;;  %s701_s3 = inlined_call_operand.vmem [shape: bf16[64,64], index: 3, kind: input, shape index: {}]   ;;  %s702_s4 = inlined_call_operand.vmem [shape: f32[64,1], index: 4, kind: input, shape index: {}]   ;;  %s703_s5 = inlined_call_operand.vmem [shape: bf16[1,64], index: 5, kind: input, shape index: {}]   ;;  %s704_s6 = inlined_call_operand.<no memory space> [shape: f32[1,1], index: 6, kind: input, shape index: {}]   ;;  %s705_s7 = inlined_call_operand.hbm [shape: f32[1,128], index: 7, kind: output, shape index: {}]  }
   0x1   :  { %v12_v0 = vstv %s704_s6 }
   0x2   :  { %13 = vst [vmem:[#allocation2] sm:$0x1] %v12_v0 }
   0x3   :  { %v519_v1 = vld [vmem:[%s698_s0] sm:$0xff]   ;;  %vm114_vm0 = vcmask 130048   ;;  %v521_v3 = vld [vmem:[%s699_s1 + $0x8] sm:$0xff]   ;;  %v552_v4 = vmov 0   ;;  %v522_v5 = vld [vmem:[%s699_s1 + $0x10] sm:$0xff]  }
   0x4   :  { %v520_v2 = vld [vmem:[%s699_s1] sm:$0xff]   ;;  %475 = vmatprep.subr.bf16.mxu0 %v519_v1  ;;  %517 = vset.pattern.permute.xlu0 %v552_v4  ;;  %v42_v7 = vld [vmem:[%s700_s2 + $0x10] sm:$0xff]  ;;  %v41_v8 = vld [vmem:[%s700_s2 + $0x8] sm:$0xff] }
   0x5   :  { %476 = vmatpush3.bf16.msra.mxu0 %v519_v1  ;;  %477 = vmatprep.mubr.msk.bf16.mxu0 %vm114_vm0, %v520_v2  ;;  %v40_v6 = vld [vmem:[%s700_s2] sm:$0xff]  ;;  %v43_v9 = vld [vmem:[%s700_s2 + $0x18] sm:$0xff]  ;;  %v45_v12 = vld [vmem:[%s700_s2 + $0x28] sm:$0xff] }
   0x6   :  { %518 = vset.pattern.permute.xlu1 %v552_v4  ;;  %50 = vperm.xlu0 %517, %v40_v6   ;;  %v523_v10 = vld [vmem:[%s699_s1 + $0x18] sm:$0xff]   ;;  %v44_v11 = vld [vmem:[%s700_s2 + $0x20] sm:$0xff] }
   0x7   :  { %60 = vperm.xlu1 %518, %v42_v7  }
   0x8   :  { %478 = vmatmul.mubr.msk.bf16.vlgmr.msra.gmra.mrb[0].mxu0 %vm114_vm0, %v521_v3 }
   0x9   :  { %481 = vmatprep.mubr.msk.bf16.mxu0 %vm114_vm0, %v522_v5 }
   0xa   :  { %55 = vperm.xlu0 %517, %v41_v8  }
   0xb   :  { %65 = vperm.xlu1 %518, %v43_v9  }
   0xc   :  { %14 = vsyncpa [#allocation4], 0  ;;  %v46_v13 = vld [vmem:[%s700_s2 + $0x30] sm:$0xff]  ;;  %v47_v14 = vld [vmem:[%s700_s2 + $0x38] sm:$0xff]  ;;  %vm280_vm1 = vcmask 523264   ;;  %v553_v0 = vmov 0.0  }
   0xd   :  { %v212_v15 = vld [vmem:[%s702_s4] sm:$0xff]  ;;  %v213_v16 = vld [vmem:[%s702_s4 + $0x8] sm:$0xff]  ;;  %v214_v17 = vld [vmem:[%s702_s4 + $0x10] sm:$0xff]  ;;  %501 = vmatprep.subr.bf16.mxu0 %v553_v0  ;;  %vm554_vm2 = vmmov 0   ;;  %s555_s24 = smov [#allocation3]  }
   0xe   :  { %70 = vperm.xlu0 %517, %v44_v11   ;;  %v215_v18 = vld [vmem:[%s702_s4 + $0x18] sm:$0xff]  ;;  %v216_v19 = vld [vmem:[%s702_s4 + $0x20] sm:$0xff]  ;;  %v217_v20 = vld [vmem:[%s702_s4 + $0x28] sm:$0xff]  ;;  %s431_s1 = sshll.u32 %s555_s24, 4  ;;  %s432_s1 = int_to_ptr.vmem [resolvable:$true] %s431_s1 }
   0xf   :  { %75 = vperm.xlu1 %518, %v45_v12   ;;  %v218_v21 = vld [vmem:[%s702_s4 + $0x30] sm:$0xff]  ;;  %v219_v22 = vld [vmem:[%s702_s4 + $0x38] sm:$0xff]  ;;  %v371_v23 = vld [vmem:[#allocation2] sm:$0x1]  ;;  %s528_s25 = scalar_lea.vmem %s432_s1, 16  ;;  %s532_s26 = scalar_lea.vmem %s432_s1, 32 }
  0x10   :  { %482 = vmatmul.mubr.msk.bf16.gmra.mrb[4].mxu0 %vm114_vm0, %v523_v10  ;;  %v524_v24 = vld [vmem:[%s701_s3] sm:$0xff]   ;;  %v525_v61 = vld [vmem:[%s701_s3 + $0x8] sm:$0xff]   ;;  %v526_v62 = vld [vmem:[%s701_s3 + $0x10] sm:$0xff]   ;;  %p529_p0 = scmp.ne.s32.totalorder %s432_s1, %s528_s25  ;;  %p533_p1 = scmp.lt.s32.totalorder %s432_s1, %s432_s1 }
  0x11   :  { %493 = vmatprep.mubr.msk.bf16.mxu1 %vm280_vm1, %v524_v24  ;;  %v527_v63 = vld [vmem:[%s701_s3 + $0x18] sm:$0xff]   ;;  %509 = vmatprep.mubr.msk.bf16.mxu0 %vm554_vm2, %v553_v0  ;;  %p534_p2 = scmp.lt.s32.totalorder %s532_s26, %s528_s25 }
  0x12   :  { %80 = vperm.xlu0 %517, %v46_v13  }
  0x13   :  { %85 = vperm.xlu1 %518, %v47_v14   ;;  %p535_p3 = por %p534_p2, %p533_p1 }
  0x15   :  { %p536_p4 = pnand %p535_p3, %p529_p0 }
  0x16   :  { %222 = vperm.xlu0 %517, %v212_v15  }
  0x17   :  { %227 = vperm.xlu1 %518, %v213_v16  }
  0x1a   :  { %232 = vperm.xlu0 %517, %v214_v17  }
  0x1b   :  { %237 = vperm.xlu1 %518, %v215_v18  }
  0x1e   :  { %242 = vperm.xlu0 %517, %v216_v19  }
  0x1f   :  { %247 = vperm.xlu1 %518, %v217_v20  }
  0x22   :  { %252 = vperm.xlu0 %517, %v218_v21  }
  0x23   :  { %257 = vperm.xlu1 %518, %v219_v22  }
  0x26   :  { %374 = vperm.xlu0 %517, %v371_v23  }
  0x85   :  { %v51_v25 = vpop.permute.xlu0 %50 }
  0x86   :  { %v61_v26 = vpop.permute.xlu1 %60 }
  0x89   :  { %v56_v27 = vpop.permute.xlu0 %55 }
  0x8a   :  { %v66_v28 = vpop.permute.xlu1 %65 }
  0x8d   :  { %v71_v32 = vpop.permute.xlu0 %70 }
  0x8e   :  { %v76_v37 = vpop.permute.xlu1 %75 }
  0x91   :  { %v81_v44 = vpop.permute.xlu0 %80 }
  0x92   :  { %v86_v49 = vpop.permute.xlu1 %85 }
  0x95   :  { %v223_v1 = vpop.permute.xlu0 %222 }
  0x96   :  { %v228_v2 = vpop.permute.xlu1 %227 }
  0x99   :  { %v233_v3 = vpop.permute.xlu0 %232 }
  0x9a   :  { %v238_v4 = vpop.permute.xlu1 %237 }
  0x9d   :  { %v243_v8 = vpop.permute.xlu0 %242 }
  0x9e   :  { %v248_v13 = vpop.permute.xlu1 %247 }
  0xa1   :  { %v253_v20 = vpop.permute.xlu0 %252 }
  0xdb   :  { %v479_v29 = vpop.f32.mrb[0].mxu0 }
  0xdc   :  { %v170_v30 = vadd.f32 %v479_v29, %v61_v26  ;;  %v161_v31 = vpop.f32.mrb[1].mxu0 }
  0xdd   :  { %v162_v33 = vadd.f32 %v161_v31, %v51_v25  ;;  %v480_v34 = vpop.f32.mrb[2].mxu0  ;;  %v258_v25 = vpop.permute.xlu1 %257 }
  0xde   :  { %v173_v35 = vadd.f32 %v480_v34, %v66_v28  ;;  %v164_v36 = vpop.f32.mrb[3].mxu0  ;;  %v194_v39 = vmax.f32 %v170_v30, 0.0 }
  0xdf   :  { %v165_v38 = vadd.f32 %v164_v36, %v56_v27  ;;  %v192_v41 = vmax.f32 %v162_v33, 0.0 }
  0xe0   :  { %v195_v40 = vmax.f32 %v173_v35, 0.0 }
  0xe1   :  { %v193_v42 = vmax.f32 %v165_v38, 0.0  ;;  %v377_v38 = vlaneseq }
  0xe2   :  { %v209_v43 = vpack.c.bf16 %v195_v40, %v194_v39 }
  0xe3   :  { %v483_v45 = vpop.f32.mrb[4].mxu0  ;;  %v208_v46 = vpack.c.bf16 %v193_v42, %v192_v41  ;;  %v378_v39 = vshrl.u32 %v377_v38, 7  ;;  %v375_v41 = vpop.permute.xlu0 %374 }
  0xe4   :  { %v186_v47 = vadd.f32 %v483_v45, %v81_v44  ;;  %v177_v48 = vpop.f32.mrb[5].mxu0 }
  0xe5   :  { %v178_v50 = vadd.f32 %v177_v48, %v71_v32  ;;  %v484_v51 = vpop.f32.mrb[6].mxu0  ;;  %485 = vmatprep.subr.bf16.mxu1 %v208_v46  ;;  %v379_v40 = vsub.s32 0, %v378_v39 }
  0xe6   :  { %v189_v52 = vadd.f32 %v484_v51, %v86_v49  ;;  %v180_v53 = vpop.f32.mrb[7].mxu0  ;;  %486 = vmatpush3.bf16.msra.mxu1 %v208_v46  ;;  %v198_v55 = vmax.f32 %v186_v47, 0.0 }
  0xe7   :  { %v181_v54 = vadd.f32 %v180_v53, %v76_v37  ;;  %487 = vmatprep.subr.bf16.mxu1 %v209_v43  ;;  %v196_v57 = vmax.f32 %v178_v50, 0.0  ;;  %v366_v37 = vld [vmem:[%s703_s5] sm:$0x1]  ;;  %v380_v42 = vrot.slane %v375_v41, %v379_v40 }
  0xe8   :  { %v199_v56 = vmax.f32 %v189_v52, 0.0 }
  0xe9   :  { %v197_v58 = vmax.f32 %v181_v54, 0.0 }
  0xea   :  { %v211_v59 = vpack.c.bf16 %v199_v56, %v198_v55  ;;  %488 = vmatpush3.bf16.msra.mxu1 %v209_v43 }
  0xeb   :  { %v210_v60 = vpack.c.bf16 %v197_v58, %v196_v57 }
  0xed   :  { %489 = vmatprep.subr.bf16.mxu1 %v210_v60 }
  0xee   :  { %490 = vmatpush3.bf16.msra.mxu1 %v210_v60 }
  0xef   :  { %491 = vmatprep.subr.bf16.mxu1 %v211_v59 }
  0xf2   :  { %492 = vmatpush3.bf16.msra.mxu1 %v211_v59 }
  0xf5   :  { %494 = vmatmul.mubr.msk.bf16.vlgmr.msra.gmra.mrb[0].mxu1 %vm280_vm1, %v525_v61 }
  0xf6   :  { %497 = vmatprep.mubr.msk.bf16.mxu1 %vm280_vm1, %v526_v62 }
  0xfd   :  { %498 = vmatmul.mubr.msk.bf16.gmra.mrb[4].mxu1 %vm280_vm1, %v527_v63 }
 0x1c8   :  { %v495_v5 = vpop.f32.mrb[0].mxu1 }
 0x1c9   :  { %v336_v6 = vadd.f32 %v495_v5, %v233_v3  ;;  %v327_v7 = vpop.f32.mrb[1].mxu1 }
 0x1ca   :  { %v328_v9 = vadd.f32 %v327_v7, %v223_v1  ;;  %v496_v10 = vpop.f32.mrb[2].mxu1 }
 0x1cb   :  { %v339_v11 = vadd.f32 %v496_v10, %v238_v4  ;;  %v330_v12 = vpop.f32.mrb[3].mxu1  ;;  %v360_v15 = vmax.f32 %v336_v6, 0.0 }
 0x1cc   :  { %v331_v14 = vadd.f32 %v330_v12, %v228_v2  ;;  %v358_v17 = vmax.f32 %v328_v9, 0.0 }
 0x1cd   :  { %v361_v16 = vmax.f32 %v339_v11, 0.0 }
 0x1ce   :  { %v359_v18 = vmax.f32 %v331_v14, 0.0 }
 0x1cf   :  { %v368_v19 = vpack.c.bf16 %v361_v16, %v360_v15 }
 0x1d0   :  { %v367_v21 = vpack.c.bf16 %v359_v18, %v358_v17  ;;  %v499_v22 = vpop.f32.mrb[4].mxu1 }
 0x1d1   :  { %v352_v23 = vadd.f32 %v499_v22, %v253_v20  ;;  %v343_v24 = vpop.f32.mrb[5].mxu1 }
 0x1d2   :  { %v344_v26 = vadd.f32 %v343_v24, %v243_v8  ;;  %v500_v27 = vpop.f32.mrb[6].mxu1  ;;  %502 = vmatpush3.bf16.msra.mxu0 %v367_v21 }
 0x1d3   :  { %v355_v28 = vadd.f32 %v500_v27, %v258_v25  ;;  %v346_v29 = vpop.f32.mrb[7].mxu1  ;;  %503 = vmatprep.subr.bf16.mxu0 %v553_v0  ;;  %v364_v31 = vmax.f32 %v352_v23, 0.0 }
 0x1d4   :  { %v347_v30 = vadd.f32 %v346_v29, %v248_v13  ;;  %v362_v33 = vmax.f32 %v344_v26, 0.0 }
 0x1d5   :  { %v365_v32 = vmax.f32 %v355_v28, 0.0 }
 0x1d6   :  { %v363_v34 = vmax.f32 %v347_v30, 0.0  ;;  %504 = vmatpush3.bf16.msra.mxu0 %v368_v19 }
 0x1d7   :  { %v370_v35 = vpack.c.bf16 %v365_v32, %v364_v31  ;;  %505 = vmatprep.subr.bf16.mxu0 %v553_v0 }
 0x1d8   :  { %v369_v36 = vpack.c.bf16 %v363_v34, %v362_v33 }
 0x1da   :  { %506 = vmatpush3.bf16.msra.mxu0 %v369_v36 }
 0x1db   :  { %507 = vmatprep.subr.bf16.mxu0 %v553_v0 }
 0x1de   :  { %508 = vmatpush3.bf16.msra.mxu0 %v370_v35 }
 0x1e1   :  { %510 = vmatmul.mubr.msk.bf16.vlgmr.msra.gmra.mrb[8].mxu0 %vm280_vm1, %v366_v37 }
 0x2b4   :  { %v418_v43 = vpop.f32.mrb[8].mxu0 }
 0x2b5   :  { %v419_v44 = vadd.f32 %v418_v43, %v380_v42  ;;  %v511_v45 = vpop.f32.mrb[9].mxu0 }
 0x2b6   :  { %v421_v46 = vpop.f32.mrb[10].mxu0 }
 0x2b7   :  { %424 = vst [vmem:[#allocation3] sm:$0x1] %v419_v44  ;;  %v512_v47 = vpop.f32.mrb[11].mxu0 }
 0x2b8   :  { %539 = shalt.err (!%p536_p4)
}
 0x2b9   :  { %s540_s28 = scalar_lea.hbm %s705_s7, 16 }
 0x2ba   :  { %p541_p5 = scmp.ne.s32.totalorder %s705_s7, %s540_s28  ;;  %p544_p6 = scmp.lt.u32.totalorder %s540_s28, %s705_s7 }
 0x2bc   :  { %p546_p7 = pnand %p544_p6, %p541_p5 }
 0x2be   :  { %549 = shalt.err (!%p546_p7)
}
 0x2bf   :  { %434 = dma.vmem_to_hbm [thread:$0]  %s432_s1, 16, %s705_s7, [#allocation4]  }
 0x2c0   :  { %550 = dma.done.wait [#allocation4], 16  }
 0x2c1   :  { %551 = vsyncadd [#allocation4], 4294967280 }
 0x2c2   :  { %438 = vsyncpa [#allocation4], 1 }

</bundles_post_ra>
